<compile_context>
chip_gen: v7x
topology: tpu7x:2x2x1
jax: 0.10.0
libtpu: 0.0.40
codegen_flags: <defaults>
</compile_context>

<pallas_src>
import jax
import jax.numpy as jnp
from jax import lax
from jax.experimental import pallas as pl
from jax.experimental.pallas import tpu as pltpu

EPS_L2 = 1e-12   # F.normalize eps
EPS_BN = 1e-5    # BatchNorm1d eps
LANE = 128


def _round_up(x, m):
    return ((x + m - 1) // m) * m


def _pad2(a, rows, cols):
    out = jnp.zeros((rows, cols), a.dtype)
    return out.at[:a.shape[0], :a.shape[1]].set(a)


def _vmem_capacity_bytes():
    try:
        info = pltpu.get_tpu_info()
        cap = int(getattr(info, "vmem_capacity_bytes", 0) or 0)
        if cap > 0:
            return cap
    except Exception:
        pass
    return 64 << 20   # conservative fallback: v7x per-TensorCore VMEM


def _compiler_params(vmem_estimate_bytes, semantics):
    # ~80% of physical VMEM (v5e/v6e ~102 MiB, v7x ~51 MiB) leaves headroom
    # for compiler-internal scratch; never ask for less than 16 MiB.
    ceiling = int(_vmem_capacity_bytes() * 0.8)
    limit = int(min(max(vmem_estimate_bytes + (4 << 20), 32 << 20), ceiling))
    limit = max(limit, 16 << 20)
    return pltpu.CompilerParams(dimension_semantics=semantics,
                                vmem_limit_bytes=limit)


# --------------------------- pallas_call wrappers -----------------------------
def _embed(x_bf, w_emb, b_emb, *, tn):
    # embedding_h: Linear(in_dim, in_dim); bf16 MXU inputs, f32 accumulation.
    np_, kp = x_bf.shape
    d0 = w_emb.shape[1]

    def kernel(x_ref, w_ref, b_ref, o_ref):
        z = jnp.dot(x_ref[...], w_ref[...],
                    preferred_element_type=jnp.float32) + b_ref[...]
        o_ref[...] = z.astype(o_ref.dtype)

    est = 2 * (tn * kp * 2 + kp * d0 * 2 + d0 * 4 + tn * d0 * 2) + tn * d0 * 4
    return pl.pallas_call(
        kernel,
        out_shape=jax.ShapeDtypeStruct((np_, d0), jnp.bfloat16),
        grid_spec=pltpu.PrefetchScalarGridSpec(
            num_scalar_prefetch=0, grid=(np_ // tn,),
            in_specs=[pl.BlockSpec((tn, kp), lambda i: (i, 0)),
                      pl.BlockSpec((kp, d0), lambda i: (0, 0)),
                      pl.BlockSpec((1, d0), lambda i: (0, 0))],
            out_specs=pl.BlockSpec((tn, d0), lambda i: (i, 0))),
        compiler_params=_compiler_params(est, ("parallel",)),
    )(x_bf, w_emb, b_emb)


def _layer(adj_i8, inv_deg, h, w_stack, b, scale, shift, *, tn, g_pad, tiles_per_graph):
    np_, din = h.shape
    dout = w_stack.shape[1]

    def kernel(adj_ref, invdeg_ref, hg_ref, w_ref, b_ref, scale_ref, shift_ref, o_ref):
        # MeanAggregator on this tile's OWN graph block (block-diagonal batching):
        # adjacency streamed as int8 ({0,1}, exact), cast to bf16 at the MXU.
        a = adj_ref[...].astype(jnp.bfloat16)                      # (tn, g_pad)
        hg = hg_ref[...]                                           # (g_pad, din)
        c = jnp.dot(a, hg, preferred_element_type=jnp.float32) * invdeg_ref[...]

        # self rows sliced out of the resident per-graph h block (no extra stream)
        off = pl.multiple_of((pl.program_id(0) % tiles_per_graph) * tn, tn)
        hrow = hg_ref[pl.ds(off, tn), :]

        # NodeApply: Linear_{2*in->out}(cat([h, c], 1)) as one K = 2*Din matmul.
        hc = jnp.concatenate([hrow, c.astype(jnp.bfloat16)], axis=-1)
        z = jnp.dot(hc, w_ref[...], preferred_element_type=jnp.float32) + b_ref[...]

        # F.normalize(z, p=2, dim=1): z * rsqrt(max(||z||^2, eps^2))  (EUP).
        ssq = jnp.sum(z * z, axis=-1, keepdims=True)
        z = z * lax.rsqrt(jnp.maximum(ssq, EPS_L2 * EPS_L2))

        # relu + eval-mode BatchNorm1d folded into scale/shift.
        hout = jnp.maximum(z, 0.0) * scale_ref[...] + shift_ref[...]
        o_ref[...] = hout.astype(o_ref.dtype)

    est = 2 * (tn * g_pad * 1 + tn * 4 + g_pad * din * 2
               + 2 * din * dout * 2 + 3 * dout * 4 + tn * dout * 2)
    est += tn * (2 * din) * 2 + 2 * tn * dout * 4     # hc / z temporaries
    return pl.pallas_call(
        kernel,
        out_shape=jax.ShapeDtypeStruct((np_, dout), jnp.bfloat16),
        grid_spec=pltpu.PrefetchScalarGridSpec(
            num_scalar_prefetch=0, grid=(np_ // tn,),
            in_specs=[
                pl.BlockSpec((tn, g_pad), lambda i: (i, 0)),                     # adj (int8)
                pl.BlockSpec((tn, 1), lambda i: (i, 0)),                         # 1/deg
                pl.BlockSpec((g_pad, din), lambda i: (i // tiles_per_graph, 0)),  # this graph's h
                pl.BlockSpec((2 * din, dout), lambda i: (0, 0)),                  # stacked weight
                pl.BlockSpec((1, dout), lambda i: (0, 0)),                        # bias
                pl.BlockSpec((1, dout), lambda i: (0, 0)),                        # BN scale
                pl.BlockSpec((1, dout), lambda i: (0, 0)),                        # BN shift
            ],
            out_specs=pl.BlockSpec((tn, dout), lambda i: (i, 0))),
        compiler_params=_compiler_params(est, ("parallel",)),
    )(adj_i8, inv_deg, h, w_stack, b, scale, shift)


def _readout(memb_bf, inv_cnt, h, w_ro, *, tn):
    # dgl.mean_nodes + readout_mlp (Linear, no bias), tiled over the node axis.
    bsz, np_ = memb_bf.shape
    d = h.shape[1]
    cp = w_ro.shape[1]

    def kernel(memb_ref, invcnt_ref, h_ref, wro_ref, o_ref, acc_ref):
        @pl.when(pl.program_id(0) == 0)
        def _():
            acc_ref[...] = jnp.zeros_like(acc_ref)

        acc_ref[...] += jnp.dot(memb_ref[...], h_ref[...],
                                preferred_element_type=jnp.float32)

        @pl.when(pl.program_id(0) == pl.num_programs(0) - 1)
        def _():
            hg = acc_ref[...] * invcnt_ref[...]
            o_ref[...] = jnp.dot(hg.astype(jnp.bfloat16), wro_ref[...],
                                 preferred_element_type=jnp.float32)

    est = (2 * (bsz * tn * 2 + tn * d * 2 + d * cp * 2 + bsz * 4 + bsz * cp * 4)
           + bsz * d * 4)
    return pl.pallas_call(
        kernel,
        out_shape=jax.ShapeDtypeStruct((bsz, cp), jnp.float32),
        grid_spec=pltpu.PrefetchScalarGridSpec(
            num_scalar_prefetch=0, grid=(np_ // tn,),
            in_specs=[pl.BlockSpec((bsz, tn), lambda i: (0, i)),
                      pl.BlockSpec((bsz, 1), lambda i: (0, 0)),
                      pl.BlockSpec((tn, d), lambda i: (i, 0)),
                      pl.BlockSpec((d, cp), lambda i: (0, 0))],
            out_specs=pl.BlockSpec((bsz, cp), lambda i: (0, 0)),
            scratch_shapes=[pltpu.VMEM((bsz, d), jnp.float32)]),
        compiler_params=_compiler_params(est, ("arbitrary",)),
    )(memb_bf, inv_cnt, h, w_ro)


# ------------------------------ forward pass ----------------------------------
def graphsage_net2_forward(x, adj, memb, params, *, row_tile=512):
    n, in_dim = x.shape
    bsz = memb.shape[0]
    n_classes = params["w_ro_t"].shape[1]

    # ---- derive per-node graph id / position from the membership matrix ------
    memb_f = memb.astype(jnp.float32)
    counts = jnp.sum(memb_f, axis=1)                                    # (B,)
    graph_id = jnp.argmax(memb_f, axis=0).astype(jnp.int32)             # (N,)
    pos = jnp.sum(memb_f * (jnp.cumsum(memb_f, axis=1) - 1.0),
                  axis=0).astype(jnp.int32)                             # (N,)

    # TODO(synk): per-graph capacity is derived from data, so this wrapper is
    #             eager-only; pass a static capacity to make it jit-able.
    max_nodes = int(jnp.max(counts))
    g_pad = _round_up(max(max_nodes, 1), LANE)      # uniform per-graph padding

    row_tile = max(int(row_tile), LANE)
    if g_pad <= row_tile:
        tn = g_pad
    else:
        tn = LANE
        c = (row_tile // LANE) * LANE
        while c > LANE:
            if g_pad % c == 0:
                tn = c
                break
            c -= LANE
    tiles_per_graph = g_pad // tn
    np_ = bsz * g_pad                                # packed, padded node count

    # ---- pack node data per graph (block-diagonal batching) ------------------
    row_idx = graph_id * g_pad + pos                                   # (N,)
    k_pad = _round_up(in_dim, 16)                                      # embed K dim
    d0_pad = _round_up(in_dim, LANE)                                   # layer-0 Din

    x_bf = jnp.zeros((n, k_pad), jnp.bfloat16).at[:, :in_dim].set(x.astype(jnp.bfloat16))
    x_packed = jnp.zeros((np_, k_pad), jnp.bfloat16).at[row_idx].set(x_bf)

    # per-graph adjacency blocks (a DGL-batched graph has no cross-graph edges)
    col_onehot = jax.nn.one_hot(pos, g_pad, dtype=jnp.float32)         # (N, g_pad)
    adj_rows = jnp.zeros((np_, n), jnp.float32).at[row_idx].set(adj.astype(jnp.float32))
    adj_packed = adj_rows @ col_onehot                                 # (np_, g_pad)
    adj_i8 = adj_packed.astype(jnp.int8)            # entries {0,1}: exact, half the bytes

    inv_deg = 1.0 / jnp.maximum(jnp.sum(adj_packed, axis=1, keepdims=True), 1.0)

    within = (jnp.arange(g_pad)[None, :] < counts[:, None]).astype(jnp.float32)
    memb_packed = (jnp.eye(bsz, dtype=jnp.float32)[:, :, None]
                   * within[None, :, :]).reshape(bsz, np_)
    memb_bf = memb_packed.astype(jnp.bfloat16)
    inv_cnt = 1.0 / jnp.maximum(counts[:, None], 1.0)                  # (B, 1)

    w_emb = _pad2(params["w_emb_t"], k_pad, d0_pad).astype(jnp.bfloat16)
    b_emb = _pad2(params["b_emb"], 1, d0_pad)

    h = _embed(x_packed, w_emb, b_emb, tn=tn)                          # (np_, d0_pad) bf16

    d_prev = d0_pad
    for lp in params["layers"]:
        d_in, d_out = lp["w_self_t"].shape
        d_out_p = _round_up(d_out, LANE)
        # stack W_self / W_neigh into one (2*Din, Dout) matmul operand
        w_stack = jnp.zeros((2 * d_prev, d_out_p), jnp.float32)
        w_stack = w_stack.at[:d_in, :d_out].set(lp["w_self_t"])
        w_stack = w_stack.at[d_prev:d_prev + d_in, :d_out].set(lp["w_neigh_t"])
        w_stack = w_stack.astype(jnp.bfloat16)
        b_p = _pad2(lp["b"], 1, d_out_p)
        # fold eval-mode BatchNorm into scale/shift
        scale = lp["gamma"] * lax.rsqrt(lp["rvar"] + EPS_BN)
        shift = lp["beta"] - lp["rmean"] * scale
        scale_p = _pad2(scale, 1, d_out_p)
        shift_p = _pad2(shift, 1, d_out_p)

        h = _layer(adj_i8, inv_deg, h, w_stack, b_p, scale_p, shift_p,
                   tn=tn, g_pad=g_pad, tiles_per_graph=tiles_per_graph)
        d_prev = d_out_p

    cp = _round_up(n_classes, LANE)
    w_ro = _pad2(params["w_ro_t"], d_prev, cp).astype(jnp.bfloat16)
    logits_p = _readout(memb_bf, inv_cnt, h, w_ro, tn=tn)
    return logits_p[:, :n_classes]


# -------------------- pure-JAX reference (for correctness check) --------------
def reference_forward(x, adj, memb, params):
    h = x @ params["w_emb_t"] + params["b_emb"]
    deg = jnp.maximum(jnp.sum(adj, axis=1, keepdims=True), 1.0)
    for lp in params["layers"]:
        c = (adj @ h) / deg
        z = h @ lp["w_self_t"] + c @ lp["w_neigh_t"] + lp["b"]
        nrm = jnp.sqrt(jnp.sum(z * z, axis=-1, keepdims=True))
        z = z / jnp.maximum(nrm, EPS_L2)
        h = jnp.maximum(z, 0.0)
        h = (h - lp["rmean"]) / jnp.sqrt(lp["rvar"] + EPS_BN) * lp["gamma"] + lp["beta"]
    cnt = jnp.maximum(jnp.sum(memb, axis=1, keepdims=True), 1.0)
    hg = (memb @ h) / cnt
    return hg @ params["w_ro_t"]


# -------------------- parameter construction ----------------------------------
def make_params(key, in_dim, hidden_dims, n_classes):
    def uni(k, shape, fan_in):
        bound = 1.0 / jnp.sqrt(float(fan_in))
        return jax.random.uniform(k, shape, jnp.float32, -bound, bound)

    keys = jax.random.split(key, 2 + 3 * len(hidden_dims) + 1)
    ki = iter(keys)

    params = {
        # pre-transposed so the forward does plain (N, in) @ (in, out)
        "w_emb_t": uni(next(ki), (in_dim, in_dim), in_dim),
        "b_emb": uni(next(ki), (1, in_dim), in_dim),
        "layers": [],
    }
    d_in = in_dim
    for d_out in hidden_dims:
        fan = 2 * d_in  # NodeApply linear has input size 2*in_feats ([h, c])
        params["layers"].append({
            "w_self_t": uni(next(ki), (d_in, d_out), fan),
            "w_neigh_t": uni(next(ki), (d_in, d_out), fan),
            "b": uni(next(ki), (1, d_out), fan),
            "gamma": jnp.ones((1, d_out), jnp.float32),
            "beta": jnp.zeros((1, d_out), jnp.float32),
            "rmean": jnp.zeros((1, d_out), jnp.float32),
            "rvar": jnp.ones((1, d_out), jnp.float32),
        })
        d_in = d_out
    params["w_ro_t"] = uni(next(ki), (hidden_dims[-1], n_classes), hidden_dims[-1])
    return params


if __name__ == "__main__":
    key = jax.random.PRNGKey(0)
    k_x, k_adj, k_p = jax.random.split(key, 3)

    # small, CIFAR10-superpixel-flavoured sizes
    N, B = 64, 2               # 64 nodes total, 2 graphs of 32 nodes each
    in_dim = 32
    hidden_dims = [64, 64]
    n_classes = 10

    # node features
    x = jax.random.normal(k_x, (N, in_dim), jnp.float32)

    # random symmetric adjacency + ring (so every node has >=1 in-neighbour),
    # block-diagonal per graph, no self loops
    per = N // B
    r = jax.random.uniform(k_adj, (N, N))
    adj = (r + r.T > 1.4).astype(jnp.float32)
    ring = jnp.zeros((N, N), jnp.float32)
    idx = jnp.arange(per)
    for b in range(B):
        o = b * per
        ring = ring.at[o + idx, o + (idx + 1) % per].set(1.0)
        ring = ring.at[o + (idx + 1) % per, o + idx].set(1.0)
    block = jnp.zeros((N, N), jnp.float32)
    for b in range(B):
        block = block.at[b * per:(b + 1) * per, b * per:(b + 1) * per].set(1.0)
    adj = jnp.clip((adj + ring) * block, 0.0, 1.0)
    adj = adj * (1.0 - jnp.eye(N, dtype=jnp.float32))
    adj = jnp.clip(adj + ring, 0.0, 1.0)

    # graph membership (B, N)
    memb = jnp.zeros((B, N), jnp.float32)
    for b in range(B):
        memb = memb.at[b, b * per:(b + 1) * per].set(1.0)

    params = make_params(k_p, in_dim, hidden_dims, n_classes)

    logits = graphsage_net2_forward(x, adj, memb, params)
    logits = jax.block_until_ready(logits)

    ref = reference_forward(x, adj, memb, params)
    assert logits.shape == (B, n_classes)
    err = float(jnp.max(jnp.abs(logits - ref)))
    # bf16 MXU inputs -> small drift vs the f32 reference
    assert jnp.allclose(logits, ref, atol=5e-2, rtol=5e-2), f"max abs err {err}"

    print("KERNEL_OK")
</pallas_src>

<mosaic_0001>
module attributes {stable_mosaic.version = 11 : i64} {
  func.func @kernel(%arg0: i32, %arg1: memref<128x32xbf16, #tpu.memory_space<vmem>>, %arg2: memref<32x128xbf16, #tpu.memory_space<vmem>>, %arg3: memref<1x128xf32, #tpu.memory_space<vmem>>, %arg4: memref<128x128xbf16, #tpu.memory_space<vmem>>) attributes {dimension_semantics = [#tpu.dimension_semantics<parallel>], iteration_bounds = array<i64: 2>, scalar_prefetch = 0 : i64, scratch_operands = 0 : i64, tpu.core_type = #tpu.core_type<tc>, window_params = [{transform_indices = @transform_0, window_bounds = array<i64: 128, 32>}, {pipeline_mode = #tpu.pipeline_mode<synchronous>, transform_indices = @transform_1, window_bounds = array<i64: 32, 128>}, {pipeline_mode = #tpu.pipeline_mode<synchronous>, transform_indices = @transform_2, window_bounds = array<i64: 1, 128>}, {transform_indices = @transform_3, window_bounds = array<i64: 128, 128>}]} {
    %c0 = arith.constant 0 : index
    %c0_0 = arith.constant 0 : index
    %0 = vector.load %arg1[%c0, %c0_0] : memref<128x32xbf16, #tpu.memory_space<vmem>>, vector<128x32xbf16>
    %c0_1 = arith.constant 0 : index
    %c0_2 = arith.constant 0 : index
    %1 = vector.load %arg2[%c0_1, %c0_2] : memref<32x128xbf16, #tpu.memory_space<vmem>>, vector<32x128xbf16>
    %cst = arith.constant dense<0.000000e+00> : vector<128x128xf32>
    %2 = tpu.matmul %0, %1, %cst {dimension_numbers = #tpu.dot_dimension_numbers<[1], [0], [0], [1], [0, 0, 1, 1], [], []>} : vector<128x32xbf16>, vector<32x128xbf16>, vector<128x128xf32> -> vector<128x128xf32>
    %c0_3 = arith.constant 0 : index
    %c0_4 = arith.constant 0 : index
    %3 = vector.load %arg3[%c0_3, %c0_4] : memref<1x128xf32, #tpu.memory_space<vmem>>, vector<1x128xf32>
    %4 = vector.broadcast %3 : vector<1x128xf32> to vector<128x128xf32>
    %5 = arith.addf %2, %4 : vector<128x128xf32>
    %6 = arith.truncf %5 : vector<128x128xf32> to vector<128x128xbf16>
    %c0_5 = arith.constant 0 : index
    %c0_6 = arith.constant 0 : index
    %7 = vector.load %arg4[%c0_5, %c0_6] : memref<128x128xbf16, #tpu.memory_space<vmem>>, vector<128x128xbf16>
    tpu.vector_store %arg4[%c0_5, %c0_6], %6 {strides = array<i32>} : memref<128x128xbf16, #tpu.memory_space<vmem>>, vector<128x128xbf16>,
    return
  }
  func.func @transform_0(%arg0: i32) -> (i32, i32) {
    %c0_i32 = arith.constant 0 : i32
    %c0_i32_0 = arith.constant 0 : i32
    return %arg0, %c0_i32 : i32, i32
  }
  func.func @transform_1(%arg0: i32) -> (i32, i32) {
    %c0_i32 = arith.constant 0 : i32
    %c0_i32_0 = arith.constant 0 : i32
    %c0_i32_1 = arith.constant 0 : i32
    return %c0_i32, %c0_i32_0 : i32, i32
  }
  func.func @transform_2(%arg0: i32) -> (i32, i32) {
    %c0_i32 = arith.constant 0 : i32
    %c0_i32_0 = arith.constant 0 : i32
    %c0_i32_1 = arith.constant 0 : i32
    return %c0_i32, %c0_i32_0 : i32, i32
  }
  func.func @transform_3(%arg0: i32) -> (i32, i32) {
    %c0_i32 = arith.constant 0 : i32
    %c0_i32_0 = arith.constant 0 : i32
    return %arg0, %c0_i32 : i32, i32
  }
}

</mosaic_0001>

<bundles_post_ra>
// kernel: tpu_custom_call.1
= control target key start
LH: loop header
LB: loop body
LE: loop exit
PB: predicated region body
PF: predicated region fallthrough
CT: control target
= control target key end

     0   :  { %8 = vsyncpa [#allocation3], 0  ;;  %s947_s0 = inlined_call_operand.vmem [shape: bf16[256,32], index: 0, kind: input, shape index: {}]   ;;  %s948_s1 = inlined_call_operand.vmem [shape: bf16[32,128], index: 1, kind: input, shape index: {}]   ;;  %s949_s2 = inlined_call_operand.vmem [shape: f32[1,128], index: 2, kind: input, shape index: {}]   ;;  %s950_s3 = inlined_call_operand.hbm [shape: bf16[256,128], index: 3, kind: output, shape index: {}]  }
   0x1   :  { %10 = vsyncpa [#allocation3 + $0x1], 0  ;;  %s813_s12 = smov 0   ;;  %s815_s13 = smov 0  }
   0x2   :  { %s817_s14 = smov 0   ;;  %s819_s15 = smov 0  }
   0x3 LB: > { %s834_s16 = sadd.s32 4294967295, %s788_s15   ;;  %s530_s17 = sadd.s32 4294967294, %s788_s15   ;;  %s788_s15 = sphi %s819_s15, %s956_s15   ;;  %s784_s14 = sphi %s817_s14, %s955_s14   ;;  %s780_s13 = sphi %s815_s13, %s954_s13   ;;  %s776_s12 = sphi %s813_s12, %s953_s12  }
   0x4   : > { %s838_s18 = sadd.s32 1, %s788_s15   ;;  %s91_s19 = sadd.s32 1, %s784_s14 }
   0x5   : > { %s88_s20 = ssub.s32 %s788_s15, %s838_s18  ;;  %p101_p0 = scmp.ne.s32.totalorder %s784_s14, %s780_s13 }
   0x6   : > { %p89_p1 = scmp.eq.s32.totalorder %s88_s20, 0  ;;  %p102_p2 = scmp.eq.s32.totalorder %s834_s16, 1 }
   0x7   : > { %p107_p3 = scmp.ne.s32.totalorder %s780_s13, %s776_s12  ;;  %p108_p4 = scmp.eq.s32.totalorder %s530_s17, 1 }
   0x8   : > { %s849_s21 = scalar_select %p89_p1, %s784_s14, %s91_s19  }
   0x9   : > { %p851_p5 = por %p102_p2, %p101_p0  ;;  %p855_p6 = por %p108_p4, %p107_p3 }
   0xa   : > { %p533_p7 = scmp.ge.s32.totalorder %s788_s15, 1  ;;  %p141_p8 = scmp.lt.s32.totalorder %s788_s15, 3 }
   0xc   : > { %p142_p9 = pnand %p533_p7, %p141_p8 }
   0xd   : > { %v716_v0 = vld [vmem:[%s948_s1] sm:$0xff] (!%p142_p9)   ;;  %s535_s26 = sshll.u32 (!%p142_p9), %s834_s16, 4  ;;  %v717_v1 = vld [vmem:[%s948_s1 + $0x8] sm:$0xff] (!%p142_p9)   ;;  %vm252_vm0 = vcmask (!%p142_p9), 261120   ;;  %s162_s6 = sand.u32 (!%p142_p9), 1, %s780_s13  }
   0xe   : > { %145 = sbr.rel (%p142_p9) target bundleno = 269 (0x10d), region = 32  ;;  %p166_p10 = scmp.lt.s32.totalorder (!%p142_p9), %s535_s26, 31  ;;  %651 = vmatprep.subr.bf16.mxu0 (!%p142_p9), %v716_v0  ;;  %671 = vmatprep.subr.bf16.mxu1 (!%p142_p9), %v716_v0  ;;  %v537_v11 = vld [vmem:[%s949_s2] ss:$0 sm:$0xff] (!%p142_p9) }
   0xf   : > { %652 = vmatpush3.bf16.msra.mxu0 (!%p142_p9), %v716_v0  ;;  %673 = vmatpush3.bf16.msra.mxu1 (!%p142_p9), %v716_v0  ;;  %s534_s9 = sshll.u32 (!%p142_p9), %s162_s6, 6  ;;  %s593_s11 = sshll.u32 (!%p142_p9), %s834_s16, 10 }
  0x10   : > { %653 = vmatprep.subr.bf16.mxu0 (!%p142_p9), %v717_v1  ;;  %672 = vmatprep.subr.bf16.mxu1 (!%p142_p9), %v717_v1  ;;  %s885_s10 = scalar_lea.vmem (!%p142_p9), [#allocation2], %s534_s9  ;;  %s896_s16 = scalar_lea.hbm (!%p142_p9), %s950_s3, %s593_s11 }
  0x11   : > { %s468_s17 = sshll.u32 (!%p142_p9), %s885_s10, 4  ;;  %s906_s24 = scalar_lea.sflag (!%p142_p9), [#allocation3], %s162_s6  ;;  %s898_s17 = int_to_ptr.vmem [resolvable:$true] %s468_s17 }
  0x12   : > { %s726_s25 = scalar_lea.vmem (!%p142_p9), %s898_s17, 1024 }
  0x13   : > { %654 = vmatpush3.bf16.msra.mxu0 (!%p142_p9), %v717_v1  ;;  %674 = vmatpush3.bf16.msra.mxu1 (!%p142_p9), %v717_v1  ;;  %p727_p11 = scmp.ne.s32.totalorder (!%p142_p9), %s898_s17, %s726_s25 }
  0x15   : > { %s958_s26 = smov (!%p166_p10, %s535_s26), 31  ;;  %p728_p12 = pnand %p727_p11, %p851_p5 }
  0x16   : > { %s536_s29 = sshll.u32 %s958_s26, 2  ;;  %s790_s26 = smov [#allocation2]  }
  0x17   : > { %s169_s5 = scalar_lea.vmem %s947_s0, %s536_s29  ;;  %p729_p13 = pneg %p728_p12 }
  0x18   : > { %v718_v2 = vld [vmem:[%s169_s5] sm:$0xff]   ;;  %v720_v4 = vld [vmem:[%s169_s5 + $0x8] sm:$0xff]   ;;  %v722_v6 = vld [vmem:[%s169_s5 + $0x10] sm:$0xff]   ;;  %s730_s27 = sshll.u32 %s790_s26, 4  ;;  %s731_s27 = int_to_ptr.vmem [resolvable:$false] %s730_s27 }
  0x19   : > { %v719_v3 = vld [vmem:[%s169_s5 + $0x20] sm:$0xff]   ;;  %655 = vmatprep.mubr.msk.bf16.mxu0 %vm252_vm0, %v718_v2  ;;  %v721_v5 = vld [vmem:[%s169_s5 + $0x28] sm:$0xff]   ;;  %v723_v7 = vld [vmem:[%s169_s5 + $0x30] sm:$0xff]   ;;  %s732_s28 = scalar_lea.vmem %s731_s27, 2048  ;;  %p733_p0 = scmp.lt.s32.totalorder %s898_s17, %s731_s27 }
  0x1a   : > { %663 = vmatprep.mubr.msk.bf16.mxu1 %vm252_vm0, %v719_v3  ;;  %656 = vmatmul.mubr.msk.bf16.vlgmr.msra.gmra.mrb[0].mxu0 %vm252_vm0, %v720_v4  ;;  %v724_v8 = vld [vmem:[%s169_s5 + $0x18] sm:$0xff]   ;;  %p734_p1 = scmp.lt.s32.totalorder %s732_s28, %s726_s25 }
  0x1b   : > { %664 = vmatmul.mubr.msk.bf16.vlgmr.msra.gmra.mrb[0].mxu1 %vm252_vm0, %v721_v5  ;;  %659 = vmatprep.mubr.msk.bf16.mxu0 %vm252_vm0, %v722_v6  ;;  %v725_v9 = vld [vmem:[%s169_s5 + $0x38] sm:$0xff]  }
  0x1c   : > { %667 = vmatprep.mubr.msk.bf16.mxu1 %vm252_vm0, %v723_v7  ;;  %p735_p2 = por %p734_p1, %p733_p0 }
  0x1e   : > { %p736_p3 = pnand %p735_p2, %p729_p13 }
  0x22   : > { %660 = vmatmul.mubr.msk.bf16.gmra.mrb[4].mxu0 %vm252_vm0, %v724_v8 }
  0x23   : > { %668 = vmatmul.mubr.msk.bf16.gmra.mrb[4].mxu1 %vm252_vm0, %v725_v9 }
  0xed   : > { %v657_v10 = vpop.f32.mrb[0].mxu0 }
  0xee   : > { %v665_v12 = vpop.f32.mrb[0].mxu1  ;;  %v311_v13 = vpop.f32.mrb[1].mxu0  ;;  %v320_v16 = vadd.f32 %v657_v10, %v537_v11 }
  0xef   : > { %v343_v14 = vpop.f32.mrb[1].mxu1  ;;  %v658_v15 = vpop.f32.mrb[2].mxu0  ;;  %v352_v20 = vadd.f32 %v665_v12, %v537_v11  ;;  %v312_v21 = vadd.f32 %v537_v11, %v311_v13 }
  0xf0   : > { %v323_v17 = vadd.f32 %v658_v15, %v537_v11  ;;  %v666_v18 = vpop.f32.mrb[2].mxu1  ;;  %v314_v19 = vpop.f32.mrb[3].mxu0  ;;  %v344_v25 = vadd.f32 %v537_v11, %v343_v14 }
  0xf1   : > { %v355_v22 = vadd.f32 %v666_v18, %v537_v11  ;;  %v315_v23 = vadd.f32 %v537_v11, %v314_v19  ;;  %v346_v24 = vpop.f32.mrb[3].mxu1 }
  0xf2   : > { %v602_v26 = vpack.c.bf16 %v323_v17, %v320_v16  ;;  %v347_v27 = vadd.f32 %v537_v11, %v346_v24 }
  0xf3   : > { %v622_v28 = vpack.c.bf16 %v355_v22, %v352_v20  ;;  %v597_v29 = vpack.c.bf16 %v315_v23, %v312_v21 }
  0xf4   : > { %634 = vst [vmem:[%s885_s10 + $0x8] sm:$0xff] %v602_v26   ;;  %v617_v30 = vpack.c.bf16 %v347_v27, %v344_v25 }
  0xf5   : > { %638 = vst [vmem:[%s885_s10 + $0x28] sm:$0xff] %v622_v28   ;;  %598 = vst [vmem:[%s885_s10] sm:$0xff] %v597_v29   ;;  %v661_v31 = vpop.f32.mrb[4].mxu0 }
  0xf6   : > { %637 = vst [vmem:[%s885_s10 + $0x20] sm:$0xff] %v617_v30   ;;  %v669_v32 = vpop.f32.mrb[4].mxu1  ;;  %v327_v33 = vpop.f32.mrb[5].mxu0  ;;  %v336_v36 = vadd.f32 %v661_v31, %v537_v11 }
  0xf7   : > { %v359_v34 = vpop.f32.mrb[5].mxu1  ;;  %v662_v35 = vpop.f32.mrb[6].mxu0  ;;  %v368_v40 = vadd.f32 %v669_v32, %v537_v11  ;;  %v328_v41 = vadd.f32 %v537_v11, %v327_v33 }
  0xf8   : > { %v339_v37 = vadd.f32 %v662_v35, %v537_v11  ;;  %v670_v38 = vpop.f32.mrb[6].mxu1  ;;  %v330_v39 = vpop.f32.mrb[7].mxu0  ;;  %v360_v45 = vadd.f32 %v537_v11, %v359_v34 }
  0xf9   : > { %v371_v42 = vadd.f32 %v670_v38, %v537_v11  ;;  %v331_v43 = vadd.f32 %v537_v11, %v330_v39  ;;  %v362_v44 = vpop.f32.mrb[7].mxu1 }
  0xfa   : > { %v612_v46 = vpack.c.bf16 %v339_v37, %v336_v36  ;;  %v363_v47 = vadd.f32 %v537_v11, %v362_v44 }
  0xfb   : > { %v632_v48 = vpack.c.bf16 %v371_v42, %v368_v40  ;;  %v607_v49 = vpack.c.bf16 %v331_v43, %v328_v41 }
  0xfc   : > { %636 = vst [vmem:[%s885_s10 + $0x18] sm:$0xff] %v612_v46   ;;  %v627_v50 = vpack.c.bf16 %v363_v47, %v360_v45 }
  0xfd   : > { %640 = vst [vmem:[%s885_s10 + $0x38] sm:$0xff] %v632_v48   ;;  %635 = vst [vmem:[%s885_s10 + $0x10] sm:$0xff] %v607_v49  }
  0xfe   : > { %639 = vst [vmem:[%s885_s10 + $0x30] sm:$0xff] %v627_v50  }
  0xff   : > { %739 = shalt.err (!%p736_p3)
}
 0x100   : > { %s740_s29 = scalar_lea.hbm %s896_s16, 1024  ;;  %s744_s5 = scalar_lea.hbm %s950_s3, 2048 }
 0x101   : > { %p741_p4 = scmp.ne.s32.totalorder %s896_s16, %s740_s29  ;;  %p745_p9 = scmp.lt.u32.totalorder %s896_s16, %s950_s3 }
 0x102   : > { %p746_p10 = scmp.lt.u32.totalorder %s744_s5, %s740_s29  ;;  %p748_p12 = scmp.lt.u32.totalorder %s740_s29, %s896_s16 }
 0x103   : > { %p742_p7 = pnand %p741_p4, %p851_p5 }
 0x104   : > { %p747_p11 = por %p746_p10, %p745_p9 }
 0x105   : > { %p743_p8 = pneg %p742_p7 }
 0x106   : > { %p749_p13 = por %p748_p12, %p747_p11 }
 0x108   : > { %p750_p0 = pnand %p749_p13, %p743_p8 }
 0x10a   : > { %753 = shalt.err (!%p750_p0)
}
 0x10b   : > { %s791_s8 = smov 64   ;;  %s792_s9 = smov 4  }
 0x10c   : > { %675 = dma.vmem_to_hbm [thread:$0]  (%p851_p5), %s898_s17, 1024, %s896_s16, %s906_s24, %s791_s8, %s791_s8, %s792_s9  }
 0x10d PF: > { %p681_p1 = scmp.ge.s32.totalorder %s788_s15, 2  ;;  %s483_s10 = sand.u32 1, %s776_s12  }
 0x10e   : > { %s484_s11 = scalar_lea.sflag [#allocation3], %s483_s10 }
 0x10f   : > { %p678_p2 = pnand %p681_p1, %p855_p6 }
 0x111   : > { %771 = dma.done.wait (!%p678_p2), %s484_s11, 1024  }
 0x112   : > { %773 = vsyncadd (!%p678_p2), %s484_s11, 4294966272  ;;  %p13_p3 = scmp.ge.s32.totalorder %s838_s18, 4   ;;  %s953_s12 = smov %s780_s13 }
 0x113   : > { %s954_s13 = smov %s784_s14  ;;  %s955_s14 = smov %s849_s21 }
 0x114   : > { %s956_s15 = smov %s838_s18  ;;  %15 = sbr.rel (!%p13_p3) target bundleno = 3 (0x3), region = 67 }
 0x11b   :  { %489 = vsyncpa [#allocation3], 1 }
 0x11c   :  { %491 = vsyncpa [#allocation3 + $0x1], 1 }

</bundles_post_ra>
